<compile_context>
chip_gen: v7x
topology: tpu7x:2x2x1
jax: 0.10.0
libtpu: 0.0.40
codegen_flags: <defaults>
</compile_context>

<pallas_src>
import jax
import jax.numpy as jnp
from jax.experimental import pallas as pl
from jax.experimental.pallas import tpu as pltpu  # noqa: F401  (TPU backend)

LANES = 128            # vreg lane width
MAX_TERMS = 8 * LANES  # one full f32 vreg (8 sublanes x 128 lanes)


def _uncertain_loss_kernel(x_ref, out_ref):
    # x_ref: (2*rows, LANES) f32 in VMEM
    #   rows [0, rows)      -> losses, padded with 0.0
    #   rows [rows, 2*rows) -> sigma,  padded with 1.0  (never 0 -> no inf/NaN)
    # out_ref: (1, 1) f32 in VMEM
    rows = x_ref.shape[0] // 2
    losses = x_ref[0:rows, :]
    sigma = x_ref[rows:, :]

    sig2 = sigma * sigma
    inv_2sig2 = pl.reciprocal(sig2 + sig2, approx=True)   # EUP vrcp (0.5 folded in)
    log_sig2 = jnp.log(sig2)                               # EUP

    # per-lane fused term; padded lanes are exactly 0 (0*rcp(2) + log(1))
    term = losses * inv_2sig2 + log_sig2                   # (rows, LANES)

    # one lane reduce (+ a sublane reduce when rows > 1)
    lane_sum = jnp.sum(term, axis=1, keepdims=True)        # (rows, 1)
    out_ref[...] = jnp.sum(lane_sum, axis=0, keepdims=True)


def _pack(losses: jax.Array, sigma: jax.Array) -> jax.Array:
    """Pad (losses with 0, sigma with 1) to a lane-aligned tile and pack them."""
    v_num = losses.shape[0]
    rows = pl.cdiv(v_num, LANES)
    pad = rows * LANES - v_num
    l = jnp.pad(losses.astype(jnp.float32), (0, pad), constant_values=0.0)
    s = jnp.pad(sigma.astype(jnp.float32), (0, pad), constant_values=1.0)
    l = l.reshape(rows, LANES)
    s = s.reshape(rows, LANES)
    return jnp.concatenate([l, s], axis=0)                 # (2*rows, LANES)


def _uncertain_loss_fwd_pallas(losses: jax.Array, sigma: jax.Array) -> jax.Array:
    v_num = losses.shape[0]
    assert sigma.shape == (v_num,)
    assert v_num <= MAX_TERMS, "more than one vreg of terms not supported"
    # TODO(synk): for v_num > 1024, tile the packed (2*rows, 128) array with a grid.

    x = _pack(losses, sigma)                                # single packed input DMA
    rows2 = x.shape[0]

    out = pl.pallas_call(
        _uncertain_loss_kernel,
        out_shape=jax.ShapeDtypeStruct((1, 1), jnp.float32),
        in_specs=[pl.BlockSpec((rows2, LANES), lambda: (0, 0))],
        out_specs=pl.BlockSpec((1, 1), lambda: (0, 0)),
        cost_estimate=pl.CostEstimate(
            flops=4 * rows2 * LANES,                        # mul, add, reduce adds
            transcendentals=rows2 * LANES,                  # rcp + log on half the rows
            bytes_accessed=rows2 * LANES * 4 + 4,
        ),
    )(x)
    return out[0, 0]


@jax.custom_vjp
def uncertain_loss(losses: jax.Array, sigma: jax.Array) -> jax.Array:
    """losses: (v_num,) f32 sub-losses; sigma: (v_num,) f32 learnable parameter.

    Returns a scalar f32 matching UncertainLoss.forward(*losses):
        sum_i losses[i] / (2 sigma[i]^2) + sum_i log(sigma[i]^2)
    (sum-of-logs == log-of-product, up to over/underflow of the explicit product).
    """
    return _uncertain_loss_fwd_pallas(losses, sigma)


def _uncertain_loss_vjp_fwd(losses, sigma):
    return _uncertain_loss_fwd_pallas(losses, sigma), (losses, sigma)


def _uncertain_loss_vjp_bwd(res, g):
    losses, sigma = res
    losses = losses.astype(jnp.float32)
    sigma = sigma.astype(jnp.float32)
    sig2 = sigma * sigma
    d_losses = g * (0.5 / sig2)                                  # d/d input[i]
    d_sigma = g * (-losses / (sigma * sig2) + 2.0 / sigma)       # d/d sigma[i]
    return d_losses, d_sigma


uncertain_loss.defvjp(_uncertain_loss_vjp_fwd, _uncertain_loss_vjp_bwd)


if __name__ == "__main__":
    key = jax.random.PRNGKey(0)
    k_sigma, k_losses = jax.random.split(key)

    v_num = 4
    # deterministic stand-in for nn.Parameter(torch.randn(v_num))
    sigma = jax.random.normal(k_sigma, (v_num,), dtype=jnp.float32)
    # v_num scalar sub-task losses fed to forward(*input)
    losses = jnp.abs(jax.random.normal(k_losses, (v_num,), dtype=jnp.float32))

    result = uncertain_loss(losses, sigma)
    jax.block_until_ready(result)

    # pure-JAX reference (original PyTorch formulation) for forward correctness
    def ref_fn(l, s):
        return jnp.sum(l / (2.0 * s**2)) + jnp.log(jnp.prod(s**2))

    ref = ref_fn(losses, sigma)
    # tolerance loosened because the kernel uses the approximate EUP reciprocal
    assert jnp.allclose(result, ref, rtol=1e-3, atol=1e-3), (result, ref)

    # backward (custom_vjp, exact jnp) sanity check against autodiff of the reference
    g_l, g_s = jax.grad(uncertain_loss, argnums=(0, 1))(losses, sigma)
    r_l, r_s = jax.grad(ref_fn, argnums=(0, 1))(losses, sigma)
    assert jnp.allclose(g_l, r_l, rtol=1e-5, atol=1e-5)
    assert jnp.allclose(g_s, r_s, rtol=1e-5, atol=1e-5)

    print("KERNEL_OK")
</pallas_src>

<mosaic_0001>
module attributes {stable_mosaic.version = 11 : i64} {
  func.func @_uncertain_loss_kernel(%arg0: memref<2x128xf32, #tpu.memory_space<vmem>>, %arg1: memref<1x1xf32, #tpu.memory_space<vmem>>) attributes {dimension_semantics = [], scalar_prefetch = 0 : i64, scratch_operands = 0 : i64, tpu.core_type = #tpu.core_type<tc>} {
    %c0 = arith.constant 0 : index
    %c0_0 = arith.constant 0 : index
    %0 = vector.load %arg0[%c0, %c0_0] : memref<2x128xf32, #tpu.memory_space<vmem>>, vector<1x128xf32>
    %c1 = arith.constant 1 : index
    %c0_1 = arith.constant 0 : index
    %1 = vector.load %arg0[%c1, %c0_1] : memref<2x128xf32, #tpu.memory_space<vmem>>, vector<1x128xf32>
    %2 = arith.mulf %1, %1 : vector<1x128xf32>
    %3 = arith.addf %2, %2 : vector<1x128xf32>
    %4 = tpu.reciprocal %3 {approx = true} : vector<1x128xf32> -> vector<1x128xf32>
    %5 = math.log %2 : vector<1x128xf32>
    %6 = arith.mulf %0, %4 : vector<1x128xf32>
    %7 = arith.addf %6, %5 : vector<1x128xf32>
    %cst = arith.constant dense<0.000000e+00> : vector<1xf32>
    %8 = vector.multi_reduction <add>, %7, %cst [1] : vector<1x128xf32> to vector<1xf32>
    %9 = vector.shape_cast %8 : vector<1xf32> to vector<1x1xf32>
    %cst_2 = arith.constant dense<0.000000e+00> : vector<1xf32>
    %10 = vector.multi_reduction <add>, %9, %cst_2 [0] : vector<1x1xf32> to vector<1xf32>
    %11 = vector.shape_cast %10 : vector<1xf32> to vector<1x1xf32>
    %c0_3 = arith.constant 0 : index
    %c0_4 = arith.constant 0 : index
    %12 = vector.load %arg1[%c0_3, %c0_4] : memref<1x1xf32, #tpu.memory_space<vmem>>, vector<1x1xf32>
    tpu.vector_store %arg1[%c0_3, %c0_4], %11 {strides = array<i32>} : memref<1x1xf32, #tpu.memory_space<vmem>>, vector<1x1xf32>,
    return
  }
}

</mosaic_0001>

<bundles_post_ra>
// kernel: tpu_custom_call.1
= control target key start
LH: loop header
LB: loop body
LE: loop exit
PB: predicated region body
PF: predicated region fallthrough
CT: control target
= control target key end

     0   :  { %6 = vsyncpa [#allocation3], 0  ;;  %s142_s0 = inlined_call_operand.hbm [shape: f32[2,128], index: 0, kind: input, shape index: {}]   ;;  %s143_s1 = inlined_call_operand.hbm [shape: f32[1,1], index: 1, kind: output, shape index: {}]  }
   0x1   :  { %7 = vsyncpa [#allocation4], 0  ;;  %s106_s6 = smov [#allocation2]   ;;  %s58_s10 = scalar_lea.hbm %s142_s0, 32 }
   0x2   :  { %s14_s7 = sshll.u32 %s106_s6, 4  ;;  %p59_p0 = scmp.ne.s32.totalorder %s142_s0, %s58_s10  ;;  %s15_s7 = int_to_ptr.vmem [resolvable:$true] %s14_s7 }
   0x3   :  { %p62_p1 = scmp.lt.u32.totalorder %s58_s10, %s142_s0 }
   0x5   :  { %p64_p2 = pnand %p62_p1, %p59_p0 }
   0x7   :  { %67 = shalt.err (!%p64_p2)
}
   0x8   :  { %s68_s15 = scalar_lea.vmem %s15_s7, 32  ;;  %p73_p4 = scmp.lt.s32.totalorder %s15_s7, %s15_s7 }
   0x9   :  { %p69_p3 = scmp.ne.s32.totalorder %s15_s7, %s68_s15  ;;  %p74_p5 = scmp.lt.s32.totalorder %s68_s15, %s68_s15 }
   0xb   :  { %p75_p6 = por %p74_p5, %p73_p4 }
   0xd   :  { %p76_p7 = pnand %p75_p6, %p69_p3 }
   0xf   :  { %79 = shalt.err (!%p76_p7)
}
  0x10   :  { %17 = dma.hbm_to_vmem [thread:$0]  %s142_s0, 32, %s15_s7, [#allocation3]  }
  0x11   :  { %102 = dma.done.wait [#allocation3], 32  }
  0x12   :  { %103 = vsyncadd [#allocation3], 4294967264  ;;  %v22_v0 = vld [vmem:[#allocation2 + $0x1] sm:$0x1]  ;;  %v21_v4 = vld [vmem:[#allocation2] sm:$0x1] }
  0x13   :  { %v23_v1 = vmul.f32 %v22_v0, %v22_v0  ;;  %vm30_vm0 = vcmask 1040384   ;;  %s107_s18 = smov [#allocation5]   ;;  %vm35_vm1 = vcmask 0  }
  0x14   :  { %s43_s19 = sshll.u32 %s107_s18, 4  ;;  %s44_s19 = int_to_ptr.vmem [resolvable:$true] %s43_s19 }
  0x15   :  { %v24_v2 = vadd.f32 %v23_v1, %v23_v1  ;;  %54 = vlog2.f32 %v23_v1  ;;  %s80_s0 = scalar_lea.vmem %s44_s19, 16  ;;  %s84_s20 = scalar_lea.vmem %s44_s19, 32 }
  0x16   :  { %p81_p8 = scmp.ne.s32.totalorder %s44_s19, %s80_s0  ;;  %p85_p9 = scmp.lt.s32.totalorder %s44_s19, %s44_s19 }
  0x17   :  { %56 = vrcp.f32 %v24_v2  ;;  %p86_p10 = scmp.lt.s32.totalorder %s84_s20, %s80_s0 }
  0x19   :  { %p87_p11 = por %p86_p10, %p85_p9 }
  0x1b   :  { %p88_p12 = pnand %p87_p11, %p81_p8 }
  0x1f   :  { %v55_v3 = vpop.eup %54 }
  0x20   :  { %v27_v5 = vmul.f32 0.6931472, %v55_v3 }
  0x21   :  { %v57_v6 = vpop.eup %56 }
  0x22   :  { %v28_v7 = vmul.f32 %v57_v6, %v21_v4 }
  0x24   :  { %v29_v8 = vadd.f32 %v28_v7, %v27_v5 }
  0x26   :  { %v31_v9 = vsel %vm30_vm0, %v29_v8, 0.0 }
  0x27   :  { %32 = vadd.xlane.f32.xlu0 %v31_v9 }
  0xb4   :  { %v33_v10 = vpop.xlane.xlu0 %32 }
  0xb5   :  { %36 = vst.msk [vmem:[#allocation5] sm:$0x1] %vm35_vm1, %v33_v10 }
  0xb6   :  { %91 = shalt.err (!%p88_p12)
}
  0xb7   :  { %s92_s23 = scalar_lea.hbm %s143_s1, 16 }
  0xb8   :  { %p93_p13 = scmp.ne.s32.totalorder %s143_s1, %s92_s23  ;;  %p96_p0 = scmp.lt.u32.totalorder %s92_s23, %s143_s1 }
  0xba   :  { %p98_p1 = pnand %p96_p0, %p93_p13 }
  0xbc   :  { %101 = shalt.err (!%p98_p1)
}
  0xbd   :  { %46 = dma.vmem_to_hbm [thread:$0]  %s44_s19, 16, %s143_s1, [#allocation4]  }
  0xbe   :  { %104 = dma.done.wait [#allocation4], 16  }
  0xbf   :  { %105 = vsyncadd [#allocation4], 4294967280 }
  0xc0   :  { %50 = vsyncpa [#allocation3], 1 }
  0xc1   :  { %51 = vsyncpa [#allocation4], 1 }

</bundles_post_ra>
